<compile_context>
chip_gen: v6e
topology: v6e:2x2x1
jax: 0.10.0
libtpu: 0.0.40
codegen_flags: <defaults>
</compile_context>

<pallas_src>
import jax
import jax.numpy as jnp
from jax.experimental import pallas as pl
from jax.experimental.pallas import tpu as pltpu


def _round_up(x: int, m: int) -> int:
    return ((x + m - 1) // m) * m


def sage_gcn_kernel(adj_ref, xsrc_ref, hdst_ref, w_ref, b_ref, out_ref, acc_ref):
    """One (dst-tile, src-tile) grid step.

    adj_ref : (tm, tk)       bf16  0/1 adjacency tile
    xsrc_ref: (tk, f_pad)    f32   [ones | x | 0-pad] rows for this src tile
    hdst_ref: (tm, f_pad)    f32   [ones | x | 0-pad] rows for this dst tile
    w_ref   : (f_pad, c_pad) f32   fc_neigh weight (row 0 and pad rows are zero)
    b_ref   : (1, c_pad)     f32
    out_ref : (tm, c_pad)    f32
    acc_ref : (tm, f_pad)    f32   running  A @ [1|x]  (column 0 == in-degree)
    """
    k = pl.program_id(1)

    @pl.when(k == 0)
    def _init():
        acc_ref[...] = jnp.zeros_like(acc_ref)

    # Aggregation matmul on the MXU; the all-ones column of xsrc makes column 0
    # of the accumulator equal to the in-degree for free.
    adj = adj_ref[...].astype(jnp.float32)            # bf16 0/1 -> f32 (exact)
    acc_ref[...] += jnp.dot(adj, xsrc_ref[...],
                            preferred_element_type=jnp.float32)

    @pl.when(k == pl.num_programs(1) - 1)
    def _finalize():
        acc = acc_ref[...]                            # (tm, f_pad)
        deg = acc[:, 0:1]                             # in-degree per dst node
        inv = pl.reciprocal(deg + 1.0, approx=True)   # EUP, ~free
        # gcn aggregator: add the self (dst) feature, mean over (deg + 1).
        # Column 0 / padded columns of h hit zero rows of W -> no contribution.
        h = (acc + hdst_ref[...]) * inv
        out = jnp.dot(h, w_ref[...], preferred_element_type=jnp.float32) + b_ref[...]
        out_ref[...] = out.astype(out_ref.dtype)


def sage_gcn_forward(adj, x, weight, bias, *, tm=256, tk=1024):
    """SAGEConv('gcn') forward.

    adj: [N_dst, N_src] (0/1), x: [N_src, F_in], weight: [F_in, C] (torch W
    transposed), bias: [C].  Returns [N_dst, C] float32.
    Assumes DGL MFG convention: dst nodes are the first N_dst rows of x.
    """
    n_dst, n_src = adj.shape
    f_in = x.shape[1]
    c = weight.shape[1]

    # Tiles sized for the smallest VMEM (v7x: 64 MiB, 32 MiB scoped default):
    # live set ~ 2*(tm*tk*2B + tk*f_pad*4B + tm*f_pad*4B) + tm*f_pad*4B << 32 MiB.
    tm = min(tm, _round_up(n_dst, 8))
    tk = min(tk, _round_up(n_src, 128))

    n_dst_p = _round_up(n_dst, tm)
    n_src_p = _round_up(n_src, tk)
    # x is read through two views (src k-tiles and dst row-tiles); pad its rows
    # to cover both.  Zero rows contribute nothing (they pair with zero adj cols).
    n_rows_p = max(n_src_p, n_dst_p)
    f_pad = _round_up(f_in + 1, 128)      # +1: leading all-ones "degree" column
    c_pad = _round_up(c, 128)             # lane-dense output stores

    # TODO(synk): at real MFG sizes the sampler should emit the padded bf16
    # adjacency / augmented features directly instead of padding per call here.
    adj_p = jnp.zeros((n_dst_p, n_src_p), jnp.bfloat16)
    adj_p = adj_p.at[:n_dst, :n_src].set(adj.astype(jnp.bfloat16))

    x_aug = jnp.zeros((n_rows_p, f_pad), jnp.float32)
    x_aug = x_aug.at[:n_src, 0].set(1.0)
    x_aug = x_aug.at[:n_src, 1:1 + f_in].set(x.astype(jnp.float32))

    w_aug = jnp.zeros((f_pad, c_pad), jnp.float32)
    w_aug = w_aug.at[1:1 + f_in, :c].set(weight.astype(jnp.float32))
    b_aug = jnp.zeros((1, c_pad), jnp.float32).at[0, :c].set(bias.astype(jnp.float32))

    grid = (n_dst_p // tm, n_src_p // tk)

    out_p = pl.pallas_call(
        sage_gcn_kernel,
        out_shape=jax.ShapeDtypeStruct((n_dst_p, c_pad), jnp.float32),
        grid_spec=pltpu.PrefetchScalarGridSpec(
            num_scalar_prefetch=0,
            grid=grid,
            in_specs=[
                pl.BlockSpec((tm, tk), lambda i, k: (i, k)),        # adj tile
                pl.BlockSpec((tk, f_pad), lambda i, k: (k, 0)),     # src features
                pl.BlockSpec((tm, f_pad), lambda i, k: (i, 0)),     # dst features
                pl.BlockSpec((f_pad, c_pad), lambda i, k: (0, 0)),  # fc_neigh W
                pl.BlockSpec((1, c_pad), lambda i, k: (0, 0)),      # bias
            ],
            out_specs=pl.BlockSpec((tm, c_pad), lambda i, k: (i, 0)),
            scratch_shapes=[pltpu.VMEM((tm, f_pad), jnp.float32)],
        ),
        compiler_params=pltpu.CompilerParams(
            dimension_semantics=("parallel", "arbitrary")),
    )(adj_p, x_aug, x_aug, w_aug, b_aug)

    return out_p[:n_dst, :c]


def sage_gcn_reference(adj, x, weight, bias):
    h_dst = x[: adj.shape[0]]
    neigh = adj @ x
    deg = adj.sum(axis=-1, keepdims=True)
    h = (neigh + h_dst) / (deg + 1.0)
    return h @ weight + bias[None, :]


if __name__ == "__main__":
    # Small MFG-consistent shapes, chosen so the demo runs a multi-tile grid on
    # both axes (exercises the 'parallel' dst axis and the k-reduction path).
    N_SRC, N_DST = 272, 24            # dst nodes are the first 24 src nodes
    IN_FEATS, NUM_CLASSES = 40, 10

    key = jax.random.PRNGKey(0)
    k_adj, k_x, k_w, k_b = jax.random.split(key, 4)

    adj = (jax.random.uniform(k_adj, (N_DST, N_SRC)) < 0.1).astype(jnp.float32)
    x = jax.random.normal(k_x, (N_SRC, IN_FEATS), dtype=jnp.float32)
    weight = (jax.random.normal(k_w, (IN_FEATS, NUM_CLASSES), dtype=jnp.float32)
              * (1.0 / jnp.sqrt(IN_FEATS)))
    bias = 0.1 * jax.random.normal(k_b, (NUM_CLASSES,), dtype=jnp.float32)

    # Small tiles here so the demo runs a (2, 3) grid; the defaults (256, 1024)
    # are sized for realistic MFG block sizes.
    out = sage_gcn_forward(adj, x, weight, bias, tm=16, tk=128)
    out = jax.block_until_ready(out)

    ref = sage_gcn_reference(adj, x, weight, bias)
    assert out.shape == (N_DST, NUM_CLASSES)
    # approx reciprocal (EUP) => slightly looser tolerance than an exact divide.
    assert jnp.allclose(out, ref, atol=2e-3, rtol=2e-3), "mismatch vs JAX reference"

    print("KERNEL_OK")
</pallas_src>

<mosaic_0001>
module attributes {stable_mosaic.version = 11 : i64} {
  func.func @sage_gcn_kernel(%arg0: i32, %arg1: i32, %arg2: memref<16x128xbf16, #tpu.memory_space<vmem>>, %arg3: memref<128x128xf32, #tpu.memory_space<vmem>>, %arg4: memref<16x128xf32, #tpu.memory_space<vmem>>, %arg5: memref<128x128xf32, #tpu.memory_space<vmem>>, %arg6: memref<1x128xf32, #tpu.memory_space<vmem>>, %arg7: memref<16x128xf32, #tpu.memory_space<vmem>>, %arg8: memref<16x128xf32, #tpu.memory_space<vmem>>) attributes {dimension_semantics = [#tpu.dimension_semantics<parallel>, #tpu.dimension_semantics<arbitrary>], iteration_bounds = array<i64: 2, 3>, scalar_prefetch = 0 : i64, scratch_operands = 1 : i64, tpu.core_type = #tpu.core_type<tc>, window_params = [{transform_indices = @transform_0, window_bounds = array<i64: 16, 128>}, {transform_indices = @transform_1, window_bounds = array<i64: 128, 128>}, {transform_indices = @transform_2, window_bounds = array<i64: 16, 128>}, {pipeline_mode = #tpu.pipeline_mode<synchronous>, transform_indices = @transform_3, window_bounds = array<i64: 128, 128>}, {pipeline_mode = #tpu.pipeline_mode<synchronous>, transform_indices = @transform_4, window_bounds = array<i64: 1, 128>}, {transform_indices = @transform_5, window_bounds = array<i64: 16, 128>}]} {
    %c0_i32 = arith.constant 0 : i32
    %0 = arith.cmpi eq, %arg1, %c0_i32 : i32
    %1 = arith.extui %0 : i1 to i32
    %c0_i32_0 = arith.constant 0 : i32
    %2 = arith.cmpi ne, %1, %c0_i32_0 : i32
    scf.if %2 {
      %cst_9 = arith.constant 0.000000e+00 : f32
      %13 = vector.broadcast %cst_9 : f32 to vector<16x128xf32>
      %c0_10 = arith.constant 0 : index
      %c0_11 = arith.constant 0 : index
      %14 = vector.load %arg8[%c0_10, %c0_11] : memref<16x128xf32, #tpu.memory_space<vmem>>, vector<16x128xf32>
      tpu.vector_store %arg8[%c0_10, %c0_11], %13 {strides = array<i32>} : memref<16x128xf32, #tpu.memory_space<vmem>>, vector<16x128xf32>,
    } else {
    }
    %c0 = arith.constant 0 : index
    %c0_1 = arith.constant 0 : index
    %3 = vector.load %arg2[%c0, %c0_1] : memref<16x128xbf16, #tpu.memory_space<vmem>>, vector<16x128xbf16>
    %4 = arith.extf %3 : vector<16x128xbf16> to vector<16x128xf32>
    %c0_2 = arith.constant 0 : index
    %c0_3 = arith.constant 0 : index
    %5 = vector.load %arg8[%c0_2, %c0_3] : memref<16x128xf32, #tpu.memory_space<vmem>>, vector<16x128xf32>
    %c0_4 = arith.constant 0 : index
    %c0_5 = arith.constant 0 : index
    %6 = vector.load %arg3[%c0_4, %c0_5] : memref<128x128xf32, #tpu.memory_space<vmem>>, vector<128x128xf32>
    %cst = arith.constant dense<0.000000e+00> : vector<16x128xf32>
    %7 = tpu.matmul %4, %6, %cst {dimension_numbers = #tpu.dot_dimension_numbers<[1], [0], [0], [1], [0, 0, 1, 1], [], []>} : vector<16x128xf32>, vector<128x128xf32>, vector<16x128xf32> -> vector<16x128xf32>
    %8 = arith.addf %5, %7 : vector<16x128xf32>
    %c0_6 = arith.constant 0 : index
    %c0_7 = arith.constant 0 : index
    %9 = vector.load %arg8[%c0_6, %c0_7] : memref<16x128xf32, #tpu.memory_space<vmem>>, vector<16x128xf32>
    tpu.vector_store %arg8[%c0_6, %c0_7], %8 {strides = array<i32>} : memref<16x128xf32, #tpu.memory_space<vmem>>, vector<16x128xf32>,
    %c2_i32 = arith.constant 2 : i32
    %10 = arith.cmpi eq, %arg1, %c2_i32 : i32
    %11 = arith.extui %10 : i1 to i32
    %c0_i32_8 = arith.constant 0 : i32
    %12 = arith.cmpi ne, %11, %c0_i32_8 : i32
    scf.if %12 {
      %c0_9 = arith.constant 0 : index
      %c0_10 = arith.constant 0 : index
      %13 = vector.load %arg8[%c0_9, %c0_10] : memref<16x128xf32, #tpu.memory_space<vmem>>, vector<16x128xf32>
      %14 = vector.extract_strided_slice %13 {offsets = [0, 0], sizes = [16, 1], strides = [1, 1]} : vector<16x128xf32> to vector<16x1xf32>
      %cst_11 = arith.constant 1.000000e+00 : f32
      %15 = vector.broadcast %cst_11 : f32 to vector<16x1xf32>
      %16 = arith.addf %14, %15 : vector<16x1xf32>
      %17 = tpu.reciprocal %16 {approx = true} : vector<16x1xf32> -> vector<16x1xf32>
      %c0_12 = arith.constant 0 : index
      %c0_13 = arith.constant 0 : index
      %18 = vector.load %arg4[%c0_12, %c0_13] : memref<16x128xf32, #tpu.memory_space<vmem>>, vector<16x128xf32>
      %19 = arith.addf %13, %18 : vector<16x128xf32>
      %20 = vector.broadcast %17 : vector<16x1xf32> to vector<16x128xf32>
      %21 = arith.mulf %19, %20 : vector<16x128xf32>
      %c0_14 = arith.constant 0 : index
      %c0_15 = arith.constant 0 : index
      %22 = vector.load %arg5[%c0_14, %c0_15] : memref<128x128xf32, #tpu.memory_space<vmem>>, vector<128x128xf32>
      %cst_16 = arith.constant dense<0.000000e+00> : vector<16x128xf32>
      %23 = tpu.matmul %21, %22, %cst_16 {dimension_numbers = #tpu.dot_dimension_numbers<[1], [0], [0], [1], [0, 0, 1, 1], [], []>} : vector<16x128xf32>, vector<128x128xf32>, vector<16x128xf32> -> vector<16x128xf32>
      %c0_17 = arith.constant 0 : index
      %c0_18 = arith.constant 0 : index
      %24 = vector.load %arg6[%c0_17, %c0_18] : memref<1x128xf32, #tpu.memory_space<vmem>>, vector<1x128xf32>
      %25 = vector.broadcast %24 : vector<1x128xf32> to vector<16x128xf32>
      %26 = arith.addf %23, %25 : vector<16x128xf32>
      %c0_19 = arith.constant 0 : index
      %c0_20 = arith.constant 0 : index
      %27 = vector.load %arg7[%c0_19, %c0_20] : memref<16x128xf32, #tpu.memory_space<vmem>>, vector<16x128xf32>
      tpu.vector_store %arg7[%c0_19, %c0_20], %26 {strides = array<i32>} : memref<16x128xf32, #tpu.memory_space<vmem>>, vector<16x128xf32>,
    } else {
    }
    return
  }
  func.func @transform_0(%arg0: i32, %arg1: i32) -> (i32, i32) {
    %c0_i32 = arith.constant 0 : i32
    return %arg0, %arg1 : i32, i32
  }
  func.func @transform_1(%arg0: i32, %arg1: i32) -> (i32, i32) {
    %c0_i32 = arith.constant 0 : i32
    %c0_i32_0 = arith.constant 0 : i32
    return %arg1, %c0_i32 : i32, i32
  }
  func.func @transform_2(%arg0: i32, %arg1: i32) -> (i32, i32) {
    %c0_i32 = arith.constant 0 : i32
    %c0_i32_0 = arith.constant 0 : i32
    return %arg0, %c0_i32 : i32, i32
  }
  func.func @transform_3(%arg0: i32, %arg1: i32) -> (i32, i32) {
    %c0_i32 = arith.constant 0 : i32
    %c0_i32_0 = arith.constant 0 : i32
    %c0_i32_1 = arith.constant 0 : i32
    return %c0_i32, %c0_i32_0 : i32, i32
  }
  func.func @transform_4(%arg0: i32, %arg1: i32) -> (i32, i32) {
    %c0_i32 = arith.constant 0 : i32
    %c0_i32_0 = arith.constant 0 : i32
    %c0_i32_1 = arith.constant 0 : i32
    return %c0_i32, %c0_i32_0 : i32, i32
  }
  func.func @transform_5(%arg0: i32, %arg1: i32) -> (i32, i32) {
    %c0_i32 = arith.constant 0 : i32
    %c0_i32_0 = arith.constant 0 : i32
    return %arg0, %c0_i32 : i32, i32
  }
}

</mosaic_0001>

<bundles_post_ra>
// kernel: tpu_custom_call.1
= control target key start
LH: loop header
LB: loop body
LE: loop exit
PB: predicated region body
PF: predicated region fallthrough
CT: control target
= control target key end

     0   :  { %s1755_s0 = inlined_call_operand.hbm [shape: bf16[32,384], index: 0, kind: input, shape index: {}]   ;;  %s1756_s1 = inlined_call_operand.hbm [shape: f32[384,128], index: 1, kind: input, shape index: {}]   ;;  %s1757_s2 = inlined_call_operand.hbm [shape: f32[384,128], index: 2, kind: input, shape index: {}]   ;;  %s1758_s3 = inlined_call_operand.hbm [shape: f32[128,128], index: 3, kind: input, shape index: {}]   ;;  %s1759_s4 = inlined_call_operand.vmem [shape: f32[1,128], index: 4, kind: input, shape index: {}]   ;;  %s1760_s5 = inlined_call_operand.hbm [shape: f32[32,128], index: 5, kind: output, shape index: {}]  }
   0x1   :  { %1774 = sst [smem:[#allocation24_spill]] %s1755_s0 }
   0x2   :  { %1775 = sst [smem:[#allocation25_spill]] %s1756_s1 }
   0x3   :  { %1776 = sst [smem:[#allocation26_spill]] %s1759_s4 }
   0x4   :  { %1777 = sst [smem:[#allocation27_spill]] %s1760_s5 }
   0x5   :  { %10 = vsyncpa [#allocation4], 0 }
   0x6   :  { %12 = vsyncpa [#allocation4 + $0x1], 0 }
   0x7   :  { %13 = vsyncpa [#allocation7], 0 }
   0x8   :  { %15 = vsyncpa [#allocation7 + $0x1], 0 }
   0x9   :  { %16 = vsyncpa [#allocation10], 0 }
   0xa   :  { %17 = vsyncpa [#allocation5], 0 }
   0xb   :  { %19 = vsyncpa [#allocation5 + $0x1], 0  ;;  %s1357_s18 = smov 0   ;;  %s1359_s19 = smov 0  }
   0xc   :  { %s1361_s20 = smov 0   ;;  %s1363_s21 = smov 0  }
   0xd   :  { %s1365_s22 = smov 0   ;;  %s1367_s23 = smov 0  }
   0xe   :  { %s1369_s24 = smov 0   ;;  %s1371_s25 = smov 0  }
   0xf   :  { %s1373_s26 = smov 0   ;;  %s1375_s27 = smov 0  }
  0x10   :  { %s1377_s28 = smov 0   ;;  %s1379_s29 = smov 0  }
  0x11   :  { %s1381_s30 = smov 0   ;;  %s1383_s6 = smov 0  }
  0x12 LB: > { %1778 = sst [smem:[#allocation17_spill]] %s1279_s23  ;;  %s34_s7 = sadd.s32 1, %s1303_s29  ;;  %s1311_s6 = sphi %s1383_s6, %s25_s6   ;;  %s1307_s30 = sphi %s1381_s30, %s1833_s30   ;;  %s1303_s29 = sphi %s1379_s29, %s1832_s29   ;;  %s1299_s28 = sphi %s1377_s28, %s1831_s28   ;;  %s1295_s27 = sphi %s1375_s27, %s1830_s27   ;;  %s1291_s26 = sphi %s1373_s26, %s1829_s26   ;;  %s1287_s25 = sphi %s1371_s25, %s1828_s25   ;;  %s1283_s24 = sphi %s1369_s24, %s1827_s24   ;;  %s1279_s23 = sphi %s1367_s23, %s1819_s23   ;;  %s1275_s22 = sphi %s1365_s22, %s1826_s22   ;;  %s1271_s21 = sphi %s1363_s21, %s1825_s21   ;;  %s1267_s20 = sphi %s1361_s20, %s1824_s20   ;;  %s1263_s19 = sphi %s1359_s19, %s1823_s19   ;;  %s1259_s18 = sphi %s1357_s18, %s1822_s18  }
  0x13   : > { %1779 = sst [smem:[#allocation18_spill]] %s1295_s27  ;;  %s37_s8 = sadd.s32 1, %s1307_s30 }
  0x14   : > { %1780 = sst [smem:[#allocation19_spill]] %s1299_s28  ;;  %p35_p0 = scmp.ge.s32.totalorder %s34_s7, 3 }
  0x15   : > { %p1765_p1 = scmp.eq.s32.totalorder %s1311_s6, 0  ;;  %s72_s9 = sadd.s32 1, %s1279_s23 }
  0x16   : > { %p79_p2 = scmp.ne.s32.totalorder %s1279_s23, %s1275_s22  ;;  %s1835_s7 = smov (%p35_p0, %s34_s7), 0 }
  0x17   : > { %1781 = sst [smem:[#allocation20_spill]] %s1835_s7  ;;  %s1837_s8 = smov (!%p35_p0, %s37_s8), %s1307_s30 }
  0x18   : > { %s42_s10 = ssub.s32 %s1303_s29, %s1835_s7  ;;  %p1440_p3 = por %p79_p2, %p1765_p1 }
  0x19   : > { %p39_p4 = scmp.ge.s32.totalorder %s1837_s8, 2  ;;  %p70_p5 = scmp.eq.s32.totalorder %s42_s10, 0 }
  0x1a   : > { %p85_p6 = scmp.ne.s32.totalorder %s1275_s22, %s1271_s21  ;;  %p1764_p9 = scmp.lt.s32.totalorder %s1311_s6, 6 }
  0x1b   : > { %s1839_s8 = smov (%p39_p4, %s1837_s8), 0  ;;  %s242_s16 = sand.u32 1, %s1311_s6  }
  0x1c   : > { %1783 = sst [smem:[#allocation21_spill]] %s1839_s8  ;;  %s1453_s13 = ssub.s32 %s1307_s30, %s1839_s8 }
  0x1d   : > { %s1449_s12 = scalar_select %p70_p5, %s1279_s23, %s72_s9  }
  0x1e   : > { %s43_s14 = sor.u32 %s42_s10, %s1453_s13  ;;  %s244_s17 = sand.u32 1, %s1279_s23  }
  0x1f   : > { %1784 = sst [smem:[#allocation22_spill]] %s1449_s12  ;;  %p1457_p8 = scmp.eq.s32.totalorder %s43_s14, 0 }
  0x20   : > { %s750_s7 = sshll.u32 %s244_s17, 7  ;;  %s770_s5 = sshll.u32 %s1303_s29, 11 }
  0x21   : > { %s1786_s1 = sld [smem:[#allocation25_spill]]  ;;  %s246_s12 = scalar_lea.vmem [#allocation6], %s750_s7 }
  0x22   : > { %s253_s8 = sshll.u32 %s246_s12, 4  ;;  %p1472_p10 = pnand %p1764_p9, %p1440_p3  ;;  %s254_s8 = int_to_ptr.vmem [resolvable:$true] %s253_s8 }
  0x23   : > { %s1476_s14 = scalar_lea.sflag [#allocation7], %s242_s16  ;;  %s1058_s17 = scalar_lea.vmem %s254_s8, 2048 }
  0x24   : > { %p1047_p11 = pneg %p1472_p10  ;;  %p1059_p12 = scmp.ne.s32.totalorder %s254_s8, %s1058_s17 }
  0x25   : > { %s1313_s4 = smov [#allocation6]  }
  0x26   : > { %p1061_p13 = pnand %p1059_p12, %p1047_p11 }
  0x27   : > { %s252_s9 = scalar_lea.hbm %s1786_s1, %s770_s5  ;;  %s1063_s5 = sshll.u32 %s1313_s4, 4  ;;  %s1064_s5 = int_to_ptr.vmem [resolvable:$false] %s1063_s5 }
  0x28   : > { %p1062_p0 = pneg %p1061_p13  ;;  %s1065_s28 = scalar_lea.vmem %s1064_s5, 4096 }
  0x29   : > { %p1066_p2 = scmp.lt.s32.totalorder %s254_s8, %s1064_s5  ;;  %p1067_p4 = scmp.lt.s32.totalorder %s1065_s28, %s1058_s17 }
  0x2b   : > { %p1068_p3 = por %p1067_p4, %p1066_p2 }
  0x2d   : > { %p1069_p5 = pnand %p1068_p3, %p1062_p0 }
  0x2f   : > { %1072 = shalt.err (!%p1069_p5)
}
  0x30   : > { %s1770_s7 = smov 128   ;;  %s1771_s11 = smov 8  }
  0x31   : > { %906 = dma.hbm_to_vmem [thread:$0]  (!%p1472_p10), %s252_s9, 2048, %s254_s8, %s1476_s14, %s1770_s7, %s1770_s7, %s1771_s11  }
  0x32   : > { %s1487_s12 = sadd.s32 4294967295, %s1311_s6   ;;  %p743_p11 = scmp.ge.s32.totalorder %s1311_s6, 1 }
  0x33   : > { %p1772_p12 = scmp.eq.s32.totalorder %s1487_s12, 0  ;;  %p190_p0 = scmp.lt.s32.totalorder %s1311_s6, 7 }
  0x34   : > { %s1316_s8 = smov [#allocation9]   ;;  %s46_s17 = sadd.s32 1, %s1291_s26 }
  0x35   : > { %p1498_p2 = por %p85_p6, %p1772_p12  ;;  %p1502_p4 = pnand %p743_p11, %p190_p0 }
  0x36   : > { %s202_s9 = sshll.u32 %s1316_s8, 4  ;;  %p53_p5 = scmp.ne.s32.totalorder %s1291_s26, %s1287_s25  ;;  %s203_s9 = int_to_ptr.vmem [resolvable:$true] %s202_s9 }
  0x37   : > { %s1788_s16 = scalar_select %p1498_p2, 1, 0 }
  0x38   : > { %p896_p10 = pneg %p1502_p4  ;;  %s1084_s21 = scalar_lea.vmem %s203_s9, 2048 }
  0x39   : > { %1789 = sst [smem:[#allocation23_spill]] %s1788_s16  ;;  %p1085_p6 = scmp.ne.s32.totalorder %s203_s9, %s1084_s21 }
  0x3a   : > { %p897_p3 = pnand %p896_p10, %p1772_p12  ;;  %p1092_p1 = scmp.lt.s32.totalorder %s203_s9, %s203_s9 }
  0x3b   : > { %p1093_p11 = scmp.lt.s32.totalorder %s1084_s21, %s1084_s21 }
  0x3c   : > { %p1075_p13 = pneg %p897_p3 }
  0x3d   : > { %p1094_p0 = por %p1093_p11, %p1092_p1 }
  0x3e   : > { %p1087_p7 = pnand %p1085_p6, %p1075_p13 }
  0x40   : > { %p1088_p9 = pneg %p1087_p7 }
  0x42   : > { %p1095_p2 = pnand %p1094_p0, %p1088_p9 }
  0x44   : > { %1098 = shalt.err (!%p1095_p2)
}
  0x45   : > { %899 = dma.hbm_to_vmem [thread:$0]  (!%p897_p3), %s1758_s3, 2048, %s203_s9, [#allocation10], %s1770_s7, %s1770_s7, %s1771_s11  }
  0x46   : > { %s1522_s28 = scalar_select %p1457_p8, %s1291_s26, %s46_s17  }
  0x47   : > { %p1791_p1 = scmp.eq.s32.totalorder %s1311_s6, 0  ;;  %p59_p9 = scmp.ne.s32.totalorder %s1287_s25, %s1283_s24 }
  0x48   : > { %s219_s8 = sand.u32 1, %s1291_s26   ;;  %s883_s21 = smul.u32 6, %s1307_s30 }
  0x49   : > { %p55_p7 = por %p1791_p1, %p53_p5  ;;  %p1535_p13 = por %p1772_p12, %p59_p9 }
  0x4a   : > { %s746_s5 = sshll.u32 %s219_s8, 3  ;;  %s229_s1 = sadd.s32 %s1303_s29, %s883_s21 }
  0x4b   : > { %s749_s23 = sshll.u32 %s229_s1, 6  ;;  %s1793_s0 = sld [smem:[#allocation24_spill]] }
  0x4c   : > { %s223_s9 = scalar_lea.vmem [#allocation3], %s746_s5  ;;  %p1794_p8 = scmp.lt.s32.totalorder %s1311_s6, 6 }
  0x4d   : > { %s232_s17 = sshll.u32 %s223_s9, 4  ;;  %s220_s7 = scalar_lea.sflag [#allocation4], %s219_s8  ;;  %s233_s17 = int_to_ptr.vmem [resolvable:$true] %s232_s17 }
  0x4e   : > { %p1545_p2 = pnand %p1794_p8, %p55_p7  ;;  %s1112_s11 = scalar_lea.vmem %s233_s17, 128 }
  0x4f   : > { %p1113_p3 = scmp.ne.s32.totalorder %s233_s17, %s1112_s11  ;;  %s1317_s1 = smov [#allocation3]  }
  0x50   : > { %p1101_p10 = pneg %p1545_p2  ;;  %s1117_s21 = sshll.u32 %s1317_s1, 4  ;;  %s1118_s21 = int_to_ptr.vmem [resolvable:$false] %s1117_s21 }
  0x51   : > { %s231_s15 = scalar_lea.hbm %s1793_s0, %s749_s23  ;;  %s1119_s23 = scalar_lea.vmem %s1118_s21, 256 }
  0x52   : > { %p1115_p5 = pnand %p1113_p3, %p1101_p10  ;;  %p1120_p11 = scmp.lt.s32.totalorder %s233_s17, %s1118_s21 }
  0x53   : > { %p1121_p0 = scmp.lt.s32.totalorder %s1119_s23, %s1112_s11 }
  0x54   : > { %p1116_p6 = pneg %p1115_p5 }
  0x55   : > { %p1122_p1 = por %p1121_p0, %p1120_p11 }
  0x57   : > { %p1123_p9 = pnand %p1122_p1, %p1116_p6 }
  0x59   : > { %1126 = shalt.err (!%p1123_p9)
}
  0x5a   : > { %s1318_s27 = smov 192   ;;  %s1319_s16 = smov 64  }
  0x5b   : > { %s1320_s11 = smov 4   ;;  %s742_s8 = sadd.s32 4294967294, %s1311_s6  }
  0x5c   : > { %903 = dma.hbm_to_vmem [thread:$0]  (!%p1545_p2), %s231_s15, 128, %s233_s17, %s220_s7, %s1318_s27, %s1319_s16, %s1320_s11  }
  0x5d   : > { %s98_s5 = sadd.s32 1, %s1267_s20  ;;  %p1796_p7 = scmp.eq.s32.totalorder %s1453_s13, 0 }
  0x5e   : > { %p105_p8 = scmp.ne.s32.totalorder %s1267_s20, %s1263_s19  ;;  %p111_p10 = scmp.ne.s32.totalorder %s1263_s19, %s1259_s18 }
  0x5f   : > { %s1558_s9 = scalar_select %p1796_p7, %s1267_s20, %s98_s5  }
  0x60   : > { %p183_p3 = scmp.eq.s32.totalorder %s742_s8, 5  ;;  %s265_s1 = sand.u32 1, %s1267_s20  }
  0x61   : > { %p1797_p5 = scmp.eq.s32.totalorder %s1311_s6, 0  ;;  %p1569_p11 = por %p111_p10, %p1772_p12 }
  0x62   : > { %p1799_p0 = scmp.eq.s32.totalorder %s1487_s12, 5  ;;  %p1579_p2 = por %p183_p3, %p111_p10 }
  0x63   : > { %p107_p6 = por %p105_p8, %p1797_p5  ;;  %s753_s15 = sshll.u32 %s265_s1, 4 }
  0x64   : > { %p1575_p1 = por %p1799_p0, %p105_p8  ;;  %s771_s17 = sshll.u32 %s1307_s30, 8 }
  0x65   : > { %s1801_s13 = scalar_select %p1579_p2, 1, 0 }
  0x66   : > { %s1800_s7 = scalar_select %p1575_p1, 1, 0 }
  0x67   : > { %s273_s27 = scalar_lea.hbm %s1757_s2, %s771_s17  ;;  %s267_s16 = scalar_lea.vmem [#allocation8], %s753_s15 }
  0x68   : > { %s274_s11 = sshll.u32 %s267_s16, 4  ;;  %p1802_p9 = scmp.lt.s32.totalorder %s1311_s6, 6  ;;  %s275_s11 = int_to_ptr.vmem [resolvable:$true] %s274_s11 }
  0x69   : > { %s1140_s5 = scalar_lea.vmem %s275_s11, 256  ;;  %s1321_s1 = smov [#allocation8]  }
  0x6a   : > { %p1589_p7 = pnand %p1802_p9, %p107_p6  ;;  %p1141_p10 = scmp.ne.s32.totalorder %s275_s11, %s1140_s5 }
  0x6b   : > { %s1145_s0 = sshll.u32 %s1321_s1, 4  ;;  %s1146_s0 = int_to_ptr.vmem [resolvable:$false] %s1145_s0 }
  0x6c   : > { %p1129_p8 = pneg %p1589_p7  ;;  %s1147_s24 = scalar_lea.vmem %s1146_s0, 512 }
  0x6d   : > { %p1148_p0 = scmp.lt.s32.totalorder %s275_s11, %s1146_s0  ;;  %p1149_p12 = scmp.lt.s32.totalorder %s1147_s24, %s1140_s5 }
  0x6e   : > { %p1143_p3 = pnand %p1141_p10, %p1129_p8 }
  0x6f   : > { %p1150_p2 = por %p1149_p12, %p1148_p0 }
  0x70   : > { %p1144_p5 = pneg %p1143_p3 }
  0x72   : > { %p1151_p1 = pnand %p1150_p2, %p1144_p5 }
  0x74   : > { %1154 = shalt.err (!%p1151_p1)
}
  0x75   : > { %s1804_s15 = smov 8   ;;  %s1805_s17 = smov 128  }
  0x76   : > { %909 = dma.hbm_to_vmem [thread:$0]  (!%p1589_p7), %s273_s27, 256, %s275_s11, %s1476_s14, %s1805_s17, %s1805_s17, %s1804_s15  }
  0x77   : > { %286 = sbr.rel (%p1502_p4) target bundleno = 765 (0x2fd), region = 40  ;;  %s288_s23 = sand.u32 (!%p1502_p4), 1, %s1287_s25  }
  0x78   : > { %s1604_s16 = sshll.u32 (!%p1502_p4), %s288_s23, 3  ;;  %s289_s0 = scalar_lea.sflag (!%p1502_p4), [#allocation4], %s288_s23 }
  0x79   : > { %s292_s5 = scalar_lea.vmem (!%p1502_p4), [#allocation3], %s1604_s16 }
  0x7c   : > { %1238 = dma.done.wait (%p1535_p13), %s289_s0, 128  }
  0x7d   : > { %1240 = vsyncadd (%p1535_p13), %s289_s0, 4294967168  ;;  %s1806_s8 = sld [smem:[#allocation23_spill]]  ;;  %s297_s14 = sand.u32 1, %s1487_s12  }
  0x7e   : > { %s299_s27 = sand.u32 1, %s1275_s22   ;;  %s298_s11 = scalar_lea.sflag [#allocation7], %s297_s14 }
  0x7f   : > { %s758_s10 = sshll.u32 %s299_s27, 7 }
  0x80   : > { %s1613_s1 = scalar_lea.vmem [#allocation6], %s758_s10 }
  0x83   : > { %p1807_p12 = scmp.ne.s32.totalorder %s1806_s8, 0 }
  0x85   : > { %1242 = dma.done.wait (%p1807_p12), %s298_s11, 2048  }
  0x86   : > { %1244 = vsyncadd (%p1807_p12), %s298_s11, 4294965248  ;;  %s308_s24 = sand.u32 1, %s1263_s19  }
  0x87   : > { %s1622_s4 = sshll.u32 %s308_s24, 4 }
  0x88   : > { %s310_s15 = scalar_lea.vmem [#allocation8], %s1622_s4 }
  0x89   : > { %1246 = dma.done.wait (%p1569_p11), %s298_s11, 256  }
  0x8a   : > { %1248 = vsyncadd (%p1569_p11), %s298_s11, 4294967040  ;;  %p1808_p4 = scmp.eq.s32.totalorder %s1487_s12, 0 }
  0x8c   : > { %1250 = dma.done.wait (%p1808_p4), [#allocation10], 2048   ;;  %p1809_p13 = pmov %p1808_p4 }
  0x8d   : > { %s1634_s17 = scalar_lea.vmem [#allocation11], %s1622_s4  ;;  %s1810_s23 = sld [smem:[#allocation18_spill]] }
  0x8e   : > { %1252 = vsyncadd (%p1809_p13), [#allocation10], 4294965248 }
  0x93   : > { %p762_p6 = scmp.ne.s32.totalorder %s1810_s23, 0 }
  0x95   : > { %358 = sbr.rel (%p762_p6) target bundleno = 156 (0x9c), region = 60 }
  0x9a   : > { %v1322_v0 = vmov 0.0  }
  0x9b   : > { %359 = vst [vmem:[#allocation2] sm:$0xff] %v1322_v0  ;;  %360 = vst [vmem:[#allocation2 + $0x8] sm:$0xff] %v1322_v0 }
  0x9c PF: > { %v382_v1 = vld [vmem:[%s1613_s1 + $0x78] sm:$0xff]  ;;  %v381_v2 = vld [vmem:[%s1613_s1 + $0x70] sm:$0xff]  ;;  %v380_v3 = vld [vmem:[%s1613_s1 + $0x68] sm:$0xff]  ;;  %s1811_s12 = sld [smem:[#allocation18_spill]] }
  0x9d   : > { %813 = vmatprep.subr.mxu0 %v382_v1  ;;  %v379_v4 = vld [vmem:[%s1613_s1 + $0x60] sm:$0xff]  ;;  %v774_v5 = vld [vmem:[%s292_s5] sm:$0xff]   ;;  %v376_v9 = vld [vmem:[%s1613_s1 + $0x48] sm:$0xff] }
  0x9e   : > { %814 = vmatpush3.msra.mxu0 %v382_v1  ;;  %v378_v6 = vld [vmem:[%s1613_s1 + $0x58] sm:$0xff]  ;;  %v775_v7 = vunpack.c.l.bf16 %v774_v5  ;;  %v377_v8 = vld [vmem:[%s1613_s1 + $0x50] sm:$0xff]  ;;  %v375_v10 = vld [vmem:[%s1613_s1 + $0x40] sm:$0xff]  ;;  %v776_v19 = vunpack.c.h.bf16 %v774_v5 }
  0x9f   : > { %815 = vmatprep.subr.mxu0 %v381_v2  ;;  %v374_v11 = vld [vmem:[%s1613_s1 + $0x38] sm:$0xff]  ;;  %v373_v12 = vld [vmem:[%s1613_s1 + $0x30] sm:$0xff]  ;;  %v372_v13 = vld [vmem:[%s1613_s1 + $0x28] sm:$0xff] }
  0xa0   : > { %816 = vmatpush3.msra.mxu0 %v381_v2  ;;  %845 = vmatprep.mubr.f32.mxu0 %v775_v7  ;;  %v371_v14 = vld [vmem:[%s1613_s1 + $0x20] sm:$0xff]  ;;  %v370_v15 = vld [vmem:[%s1613_s1 + $0x18] sm:$0xff]  ;;  %v369_v16 = vld [vmem:[%s1613_s1 + $0x10] sm:$0xff] }
  0xa1   : > { %817 = vmatprep.subr.mxu0 %v380_v3  ;;  %v368_v17 = vld [vmem:[%s1613_s1 + $0x8] sm:$0xff]  ;;  %v367_v18 = vld [vmem:[%s1613_s1] sm:$0xff] }
  0xa2   : > { %818 = vmatpush3.msra.mxu0 %v380_v3  ;;  %v366_v20 = vld [vmem:[#allocation2 + $0x8] sm:$0xff]  ;;  %v365_v22 = vld [vmem:[#allocation2] sm:$0xff]  ;;  %p763_p11 = scmp.ne.s32.totalorder %s1811_s12, 2 }
  0xa3   : > { %819 = vmatprep.subr.mxu0 %v379_v4  ;;  %s1812_s0 = sld [smem:[#allocation26_spill]] (!%p763_p11) }
  0xa4   : > { %820 = vmatpush3.msra.mxu0 %v379_v4 }
  0xa5   : > { %821 = vmatprep.subr.mxu0 %v378_v6 }
  0xa6   : > { %822 = vmatpush3.msra.mxu0 %v378_v6 }
  0xa7   : > { %823 = vmatprep.subr.mxu0 %v377_v8 }
  0xa8   : > { %824 = vmatpush3.msra.mxu0 %v377_v8 }
  0xa9   : > { %825 = vmatprep.subr.mxu0 %v376_v9 }
  0xaa   : > { %826 = vmatpush3.msra.mxu0 %v376_v9 }
  0xab   : > { %827 = vmatprep.subr.mxu0 %v375_v10 }
  0xac   : > { %828 = vmatpush3.msra.mxu0 %v375_v10 }
  0xad   : > { %829 = vmatprep.subr.mxu0 %v374_v11 }
  0xae   : > { %830 = vmatpush3.msra.mxu0 %v374_v11 }
  0xaf   : > { %831 = vmatprep.subr.mxu0 %v373_v12 }
  0xb0   : > { %832 = vmatpush3.msra.mxu0 %v373_v12 }
  0xb1   : > { %833 = vmatprep.subr.mxu0 %v372_v13 }
  0xb2   : > { %834 = vmatpush3.msra.mxu0 %v372_v13 }
  0xb3   : > { %835 = vmatprep.subr.mxu0 %v371_v14 }
  0xb4   : > { %836 = vmatpush3.msra.mxu0 %v371_v14 }
  0xb5   : > { %837 = vmatprep.subr.mxu0 %v370_v15 }
  0xb6   : > { %838 = vmatpush3.msra.mxu0 %v370_v15 }
  0xb7   : > { %839 = vmatprep.subr.mxu0 %v369_v16 }
  0xb8   : > { %840 = vmatpush3.msra.mxu0 %v369_v16 }
  0xb9   : > { %841 = vmatprep.subr.mxu0 %v368_v17 }
  0xba   : > { %842 = vmatpush3.msra.mxu0 %v368_v17 }
  0xbb   : > { %843 = vmatprep.subr.mxu0 %v367_v18 }
  0xbc   : > { %844 = vmatpush3.msra.mxu0 %v367_v18 }
  0xbd   : > { %846 = vmatmul.mubr.f32.vlgmr.msra.gmra.mxu0 %v776_v19 }
 0x17d   : > { %v847_v21 = vpop.f32.mrf.mxu0 }
 0x17e   : > { %v459_v23 = vadd.f32 %v847_v21, %v366_v20  ;;  %465 = sbr.rel (%p763_p11) target bundleno = 738 (0x2e2), region = 64 }
 0x17f   : > { %v449_v24 = vpop.f32.mrf.mxu0 }
 0x180   : > { %461 = vst [vmem:[#allocation2 + $0x8] sm:$0xff] %v459_v23  ;;  %v458_v25 = vadd.f32 %v449_v24, %v365_v22 }
 0x182   : > { %460 = vst [vmem:[#allocation2] sm:$0xff] %v458_v25 }
 0x183   : > { %v503_v28 = vld [vmem:[#allocation9 + $0x78] sm:$0xff]  ;;  %v1323_v29 = vmov 0   ;;  %v502_v32 = vld [vmem:[#allocation9 + $0x70] sm:$0xff]  ;;  %v501_v33 = vld [vmem:[#allocation9 + $0x68] sm:$0xff] }
 0x184   : > { %1040 = vset.pattern.permute.xlu0 %v1323_v29  ;;  %848 = vmatprep.subr.mxu0 %v503_v28  ;;  %v500_v34 = vld [vmem:[#allocation9 + $0x60] sm:$0xff]  ;;  %v499_v35 = vld [vmem:[#allocation9 + $0x58] sm:$0xff]  ;;  %v498_v36 = vld [vmem:[#allocation9 + $0x50] sm:$0xff] }
 0x185   : > { %849 = vmatpush3.msra.mxu0 %v503_v28  ;;  %v497_v37 = vld [vmem:[#allocation9 + $0x48] sm:$0xff]  ;;  %v496_v38 = vld [vmem:[#allocation9 + $0x40] sm:$0xff]  ;;  %v495_v39 = vld [vmem:[#allocation9 + $0x38] sm:$0xff] }
 0x186   : > { %850 = vmatprep.subr.mxu0 %v502_v32  ;;  %v494_v41 = vld [vmem:[#allocation9 + $0x30] sm:$0xff]  ;;  %v493_v43 = vld [vmem:[#allocation9 + $0x28] sm:$0xff]  ;;  %v492_v44 = vld [vmem:[#allocation9 + $0x20] sm:$0xff] }
 0x187   : > { %v1656_v27 = vld [vmem:[#allocation2 + $0x8] sm:$0xff]  ;;  %851 = vmatpush3.msra.mxu0 %v502_v32  ;;  %v491_v45 = vld [vmem:[#allocation9 + $0x18] sm:$0xff]  ;;  %v490_v46 = vld [vmem:[#allocation9 + $0x10] sm:$0xff] }
 0x188   : > { %v469_v31 = vadd.f32 1.0, %v1656_v27  ;;  %852 = vmatprep.subr.mxu0 %v501_v33  ;;  %v489_v47 = vld [vmem:[#allocation9 + $0x8] sm:$0xff]  ;;  %v488_v48 = vld [vmem:[#allocation9] sm:$0xff] }
 0x189   : > { %v466_v26 = vld [vmem:[#allocation2] sm:$0xff]  ;;  %853 = vmatpush3.msra.mxu0 %v501_v33  ;;  %v473_v51 = vld [vmem:[%s310_s15 + $0x8] sm:$0xff] }
 0x18a   : > { %v468_v30 = vadd.f32 1.0, %v466_v26  ;;  %854 = vmatprep.subr.mxu0 %v500_v34  ;;  %v472_v49 = vld [vmem:[%s310_s15] sm:$0xff]  ;;  %v475_v54 = vadd.f32 %v473_v51, %v1656_v27 }
 0x18b   : > { %855 = vmatpush3.msra.mxu0 %v500_v34  ;;  %v474_v50 = vadd.f32 %v472_v49, %v466_v26  ;;  %v764_v57 = vld [vmem:[%s1812_s0] ss:$0 sm:$0xff] }
 0x18c   : > { %1041 = vrcp.f32 %v468_v30  ;;  %856 = vmatprep.subr.mxu0 %v499_v35 }
 0x18d   : > { %1043 = vrcp.f32 %v469_v31  ;;  %857 = vmatpush3.msra.mxu0 %v499_v35 }
 0x18e   : > { %858 = vmatprep.subr.mxu0 %v498_v36 }
 0x18f   : > { %859 = vmatpush3.msra.mxu0 %v498_v36 }
 0x190   : > { %860 = vmatprep.subr.mxu0 %v497_v37 }
 0x191   : > { %861 = vmatpush3.msra.mxu0 %v497_v37 }
 0x192   : > { %862 = vmatprep.subr.mxu0 %v496_v38 }
 0x193   : > { %863 = vmatpush3.msra.mxu0 %v496_v38 }
 0x194   : > { %864 = vmatprep.subr.mxu0 %v495_v39 }
 0x195   : > { %865 = vmatpush3.msra.mxu0 %v495_v39 }
 0x196   : > { %866 = vmatprep.subr.mxu0 %v494_v41 }
 0x197   : > { %867 = vmatpush3.msra.mxu0 %v494_v41 }
 0x198   : > { %868 = vmatprep.subr.mxu0 %v493_v43 }
 0x199   : > { %v1042_v40 = vpop.eup %1041  ;;  %869 = vmatpush3.msra.mxu0 %v493_v43 }
 0x19a   : > { %478 = vperm.xlu0 %1040, %v1042_v40   ;;  %v1044_v42 = vpop.eup %1043  ;;  %870 = vmatprep.subr.mxu0 %v492_v44 }
 0x19b   : > { %871 = vmatpush3.msra.mxu0 %v492_v44 }
 0x19c   : > { %872 = vmatprep.subr.mxu0 %v491_v45 }
 0x19d   : > { %873 = vmatpush3.msra.mxu0 %v491_v45 }
 0x19e   : > { %483 = vperm.xlu0 %1040, %v1044_v42   ;;  %874 = vmatprep.subr.mxu0 %v490_v46 }
 0x19f   : > { %875 = vmatpush3.msra.mxu0 %v490_v46 }
 0x1a0   : > { %876 = vmatprep.subr.mxu0 %v489_v47 }
 0x1a1   : > { %877 = vmatpush3.msra.mxu0 %v489_v47 }
 0x1a2   : > { %878 = vmatprep.subr.mxu0 %v488_v48 }
 0x1a3   : > { %879 = vmatpush3.msra.mxu0 %v488_v48 }
 0x215   : > { %v479_v52 = vpop.permute.xlu0 %478 }
 0x216   : > { %v486_v53 = vmul.f32 %v479_v52, %v474_v50 }
 0x218   : > { %880 = vmatprep.mubr.f32.mxu0 %v486_v53 }
 0x219   : > { %v484_v55 = vpop.permute.xlu0 %483 }
 0x21a   : > { %v487_v56 = vmul.f32 %v484_v55, %v475_v54 }
 0x21c   : > { %881 = vmatmul.mubr.f32.vlgmr.msra.gmra.mxu0 %v487_v56 }
 0x2dc   : > { %v882_v58 = vpop.f32.mrf.mxu0 }
 0x2dd   : > { %v583_v59 = vadd.f32 %v882_v58, %v764_v57 }
 0x2de   : > { %v577_v60 = vpop.f32.mrf.mxu0 }
 0x2df   : > { %587 = vst [vmem:[%s1634_s17 + $0x8] sm:$0xff] %v583_v59  ;;  %v578_v61 = vadd.f32 %v764_v57, %v577_v60 }
 0x2e1   : > { %586 = vst [vmem:[%s1634_s17] sm:$0xff] %v578_v61 }
 0x2e2 PF: > { %s1813_s5 = sld [smem:[#allocation19_spill]]  ;;  %s602_s1 = sshll.u32 %s1634_s17, 4  ;;  %s1676_s1 = int_to_ptr.vmem [resolvable:$true] %s602_s1 }
 0x2e3   : > { %s1814_s10 = sld [smem:[#allocation27_spill]]  ;;  %s1680_s4 = scalar_lea.sflag [#allocation5], %s308_s24 }
 0x2e4   : > { %s1155_s15 = scalar_lea.vmem %s1676_s1, 256  ;;  %p1815_p2 = scmp.ne.s32.totalorder %s1800_s7, 0 }
 0x2e5   : > { %p1156_p1 = scmp.ne.s32.totalorder %s1676_s1, %s1155_s15  ;;  %s1324_s23 = smov [#allocation11]  }
 0x2e6   : > { %s1159_s12 = sshll.u32 %s1324_s23, 4  ;;  %s1160_s12 = int_to_ptr.vmem [resolvable:$false] %s1159_s12 }
 0x2e7   : > { %p1157_p9 = pnand %p1156_p1, %p1815_p2  ;;  %s1161_s21 = scalar_lea.vmem %s1160_s12, 512 }
 0x2e8   : > { %s772_s8 = sshll.u32 %s1813_s5, 8  ;;  %p1162_p8 = scmp.lt.s32.totalorder %s1676_s1, %s1160_s12 }
 0x2e9   : > { %s1673_s11 = scalar_lea.hbm %s1814_s10, %s772_s8  ;;  %p1158_p7 = pneg %p1157_p9 }
 0x2ea   : > { %p1163_p10 = scmp.lt.s32.totalorder %s1161_s21, %s1155_s15 }
 0x2ec   : > { %p1164_p3 = por %p1163_p10, %p1162_p8 }
 0x2ee   : > { %p1165_p5 = pnand %p1164_p3, %p1158_p7 }
 0x2f0   : > { %1168 = shalt.err (!%p1165_p5)
}
 0x2f1   : > { %s1169_s24 = scalar_lea.hbm %s1673_s11, 256  ;;  %s1173_s0 = scalar_lea.hbm %s1814_s10, 512 }
 0x2f2   : > { %p1170_p0 = scmp.ne.s32.totalorder %s1673_s11, %s1169_s24  ;;  %p1174_p13 = scmp.lt.s32.totalorder %s1673_s11, %s1814_s10 }
 0x2f3   : > { %p1175_p6 = scmp.lt.s32.totalorder %s1173_s0, %s1169_s24 }
 0x2f4   : > { %p1171_p12 = pnand %p1170_p0, %p1815_p2 }
 0x2f5   : > { %p1176_p11 = por %p1175_p6, %p1174_p13 }
 0x2f6   : > { %p1172_p4 = pneg %p1171_p12 }
 0x2f8   : > { %p1177_p1 = pnand %p1176_p11, %p1172_p4 }
 0x2fa   : > { %1180 = shalt.err (!%p1177_p1)
}
 0x2fb   : > { %s1325_s14 = smov 128   ;;  %s1326_s27 = smov 8  }
 0x2fc   : > { %894 = dma.vmem_to_hbm [thread:$0]  (%p1815_p2), %s1676_s1, 256, %s1673_s11, %s1680_s4, %s1325_s14, %s1325_s14, %s1326_s27  }
 0x2fd PF: > { %p917_p9 = scmp.ge.s32.totalorder %s1311_s6, 2  ;;  %s617_s15 = sand.u32 1, %s1259_s18  }
 0x2fe   : > { %p1816_p7 = scmp.ne.s32.totalorder %s1801_s13, 0  ;;  %s618_s23 = scalar_lea.sflag [#allocation5], %s617_s15 }
 0x300   : > { %p911_p8 = pnand %p917_p9, %p1816_p7 }
 0x302   : > { %p912_p10 = pneg %p911_p8 }
 0x304   : > { %1254 = dma.done.wait (%p912_p10), %s618_s23, 256  }
 0x305   : > { %1256 = vsyncadd (%p912_p10), %s618_s23, 4294967040  ;;  %s25_s6 = sadd.s32 1, %s1311_s6   ;;  %s1818_s7 = sld [smem:[#allocation17_spill]] }
 0x306   : > { %p1708_p3 = scmp.ge.s32.totalorder %s25_s6, 8   ;;  %s1819_s23 = sld [smem:[#allocation22_spill]] }
 0x307   : > { %s1820_s13 = sld [smem:[#allocation20_spill]]  ;;  %s1822_s18 = smov %s1263_s19 }
 0x308   : > { %s1821_s11 = sld [smem:[#allocation21_spill]]  ;;  %s1823_s19 = smov %s1267_s20 }
 0x309   : > { %s1824_s20 = smov %s1558_s9  ;;  %s1825_s21 = smov %s1275_s22 }
 0x30a   : > { %s1827_s24 = smov %s1287_s25  ;;  %s1828_s25 = smov %s1291_s26 }
 0x30b   : > { %s1826_s22 = smov %s1818_s7  ;;  %s1829_s26 = smov %s1522_s28 }
 0x30c   : > { %s1830_s27 = smov %s1303_s29  ;;  %s1831_s28 = smov %s1307_s30 }
 0x30d   : > { %s1832_s29 = smov %s1820_s13  ;;  %24 = sbr.rel (!%p1708_p3) target bundleno = 18 (0x12), region = 121 }
 0x30e   : > { %s1833_s30 = smov %s1821_s11 }
 0x312   :  { %623 = vsyncpa [#allocation4], 1 }
 0x313   :  { %625 = vsyncpa [#allocation4 + $0x1], 1 }
 0x314   :  { %626 = vsyncpa [#allocation7], 1 }
 0x315   :  { %628 = vsyncpa [#allocation7 + $0x1], 1 }
 0x316   :  { %629 = vsyncpa [#allocation10], 1 }
 0x317   :  { %630 = vsyncpa [#allocation5], 1 }
 0x318   :  { %632 = vsyncpa [#allocation5 + $0x1], 1 }

</bundles_post_ra>
